<compile_context>
chip_gen: v6e
topology: v6e:2x2x1
jax: 0.10.0
libtpu: 0.0.40
codegen_flags: <defaults>
</compile_context>

<pallas_src>
import functools

import jax
import jax.numpy as jnp
from jax import lax
from jax.experimental import pallas as pl
from jax.experimental.pallas import tpu as pltpu

ALPHA = 0.25
GAMMA = 2
LANES = 128
SUBLANES = 8


def _round_up(x, m):
    return (x + m - 1) // m * m


def _row_multiple(dtype):
    # Sublane multiple so a (rows, 128) block tiles cleanly for this dtype:
    # f32 -> 8, bf16 -> 16, int8/bool -> 32.
    itemsize = jnp.dtype(dtype).itemsize
    return SUBLANES * max(1, 4 // itemsize)


def _device_kind():
    try:
        return jax.devices()[0].device_kind.lower()
    except Exception:
        return ""


def _max_block_rows():
    kind = _device_kind()
    # v6e/v7x: 8192 rows -> 4 MiB/input block, 16 MiB double-buffered.
    # Everything else (incl. v5e's 16 MiB default scoped VMEM): 4096 rows.
    if ("v6" in kind) or ("7" in kind):
        return 8192
    return 4096


def _num_tc_splits():
    # Only v7x has 2 TensorCores per chip; on 1-TC chips a second split just
    # re-reads (and masks away) data.
    return 2 if "7" in _device_kind() else 1


def _focal_loss_kernel(pred_ref, label_ref, out_ref, *, alpha, gamma,
                       block_rows, rows_valid, needs_mask):
    i = pl.program_id(1)   # reduction axis ("arbitrary")

    @pl.when(i == 0)
    def _():
        out_ref[...] = jnp.zeros_like(out_ref)

    pred = pred_ref[...].astype(jnp.float32)
    label = label_ref[...].astype(jnp.float32)

    # Binary labels -> selects are cheaper than mul/add blends and give
    # bit-identical results for y in {0, 1}.
    pos = label > 0.5
    alpha_t = jnp.where(pos, jnp.float32(alpha), jnp.float32(1.0 - alpha))
    pt = jnp.where(pos, pred, 1.0 - pred)
    one_m_pt = 1.0 - pt
    if gamma == 2:
        focal_w = one_m_pt * one_m_pt          # explicit square -> stays on VPU
    else:
        focal_w = one_m_pt ** gamma
    # NOTE: log(pt) can be -inf when pt == 0, matching the PyTorch reference
    # (no clamp, same semantics).
    fl = -alpha_t * focal_w * jnp.log(pt)

    def accumulate(x):
        # Slab-wise accumulate into the resident (8,128) accumulator: pure
        # vreg adds on the VPU; the single cross-lane reduce is deferred to
        # the wrapper.
        out_ref[...] += jnp.sum(
            x.reshape(block_rows // SUBLANES, SUBLANES, LANES), axis=0)

    if needs_mask:
        # Only boundary / clamped-duplicate blocks pay iota+compare+select.
        rb = pl.program_id(0) * pl.num_programs(1) + i   # logical row-block id
        is_boundary = (rb + 1) * block_rows > rows_valid

        @pl.when(is_boundary)
        def _():
            row_idx = rb * block_rows + lax.broadcasted_iota(
                jnp.int32, (block_rows, LANES), 0)
            accumulate(jnp.where(row_idx < rows_valid, fl, 0.0))

        @pl.when(jnp.logical_not(is_boundary))
        def _():
            accumulate(fl)
    else:
        accumulate(fl)


def _focal_terms(pred, label, alpha, gamma):
    # Plain-jnp per-element focal term (used for the tiny unaligned tail and
    # for the reference).
    pred = pred.astype(jnp.float32)
    label = label.astype(jnp.float32)
    alpha_t = alpha * label + (1.0 - alpha) * (1.0 - label)
    pt = pred * label + (1.0 - pred) * (1.0 - label)
    return -alpha_t * ((1.0 - pt) ** gamma) * jnp.log(pt)


def focal_loss(logits, label, alpha=ALPHA, gamma=GAMMA, size_average=True):
    """Matches FocalLoss.forward: `logits` are probabilities in (0, 1).

    Inputs may be any float/int/bool dtype; the kernel casts per block, so
    bf16 preds + int8/bool labels cut HBM traffic with no kernel change."""
    pred_flat = jnp.reshape(logits, (-1,))
    label_flat = jnp.reshape(label, (-1,))
    n = pred_flat.shape[0]

    rows = n // LANES
    tail = n - rows * LANES          # < 128 elements, folded in with plain jnp
    total = jnp.float32(0.0)

    if rows > 0:
        if tail:
            pred_main = pred_flat[: rows * LANES]
            label_main = label_flat[: rows * LANES]
        else:
            pred_main = pred_flat
            label_main = label_flat
        pred2d = pred_main.reshape(rows, LANES)
        label2d = label_main.reshape(rows, LANES)

        row_mult = max(_row_multiple(pred2d.dtype), _row_multiple(label2d.dtype))
        block_rows = min(_max_block_rows(), _round_up(rows, row_mult))
        grid_rows = pl.cdiv(rows, block_rows)      # number of valid row-blocks
        num_splits = min(_num_tc_splits(), grid_rows)
        steps = pl.cdiv(grid_rows, num_splits)     # reduction steps per split
        # Mask needed whenever the logical (splits x steps x block_rows)
        # coverage exceeds the true row count.
        needs_mask = (num_splits * steps * block_rows) != rows

        def in_index_map(p, i):
            # Clamp so DMAs never start past the last valid row-block; clamped
            # (duplicate) loads are fully masked out inside the kernel.
            return (jnp.minimum(p * steps + i, grid_rows - 1), 0)

        kernel = functools.partial(
            _focal_loss_kernel,
            alpha=float(alpha),        # plain Python float, no captured tracer
            gamma=gamma,
            block_rows=block_rows,
            rows_valid=rows,
            needs_mask=needs_mask)

        if num_splits > 1 and hasattr(pltpu, "CORE_PARALLEL"):
            # Real 2-TC sharding on v7x: each core streams half the rows.
            dim_sem = (pltpu.CORE_PARALLEL, pltpu.ARBITRARY)
        else:
            dim_sem = ("parallel", "arbitrary")

        bytes_accessed = (pred2d.size * pred2d.dtype.itemsize
                          + label2d.size * label2d.dtype.itemsize
                          + num_splits * SUBLANES * LANES * 4)
        cost = pl.CostEstimate(flops=10 * rows * LANES,
                               transcendentals=rows * LANES,
                               bytes_accessed=bytes_accessed)

        partials = pl.pallas_call(
            kernel,
            out_shape=jax.ShapeDtypeStruct((num_splits, SUBLANES, LANES),
                                           jnp.float32),
            grid=(num_splits, steps),
            in_specs=[
                pl.BlockSpec((block_rows, LANES), in_index_map),
                pl.BlockSpec((block_rows, LANES), in_index_map),
            ],
            out_specs=pl.BlockSpec((None, SUBLANES, LANES),
                                   lambda p, i: (p, 0, 0)),
            compiler_params=pltpu.CompilerParams(
                dimension_semantics=dim_sem,
                vmem_limit_bytes=32 * 1024 * 1024),
            cost_estimate=cost,
        )(pred2d, label2d)

        total = total + jnp.sum(partials)   # tiny final cross-lane reduce

    if tail:
        total = total + jnp.sum(
            _focal_terms(pred_flat[rows * LANES:], label_flat[rows * LANES:],
                         alpha, gamma))

    if size_average:
        return total / jnp.float32(n)
    return total


def focal_loss_ref(logits, label, alpha=ALPHA, gamma=GAMMA, size_average=True):
    fl = _focal_terms(jnp.reshape(logits, (-1,)), jnp.reshape(label, (-1,)),
                      alpha, gamma)
    return jnp.mean(fl) if size_average else jnp.sum(fl)


if __name__ == "__main__":
    key = jax.random.PRNGKey(0)
    k1, k2 = jax.random.split(key)

    # NCHW-shaped inputs, as the PyTorch conv convention implies.
    x_shape = (2, 4, 16, 16)
    # The module's "logits" are already probabilities (it calls pt.log()),
    # so draw them in (eps, 1-eps).
    logits = jax.random.uniform(
        k1, x_shape, dtype=jnp.float32, minval=1e-4, maxval=1.0 - 1e-4)
    label = jax.random.bernoulli(k2, p=0.3, shape=x_shape).astype(jnp.float32)

    out = jax.block_until_ready(focal_loss(logits, label))
    ref = jax.block_until_ready(focal_loss_ref(logits, label))

    assert jnp.allclose(out, ref, rtol=1e-5, atol=1e-6), (out, ref)
    print("KERNEL_OK")
</pallas_src>

<mosaic_0001>
module attributes {stable_mosaic.version = 11 : i64} {
  func.func @_focal_loss_kernel(%arg0: i32, %arg1: i32, %arg2: memref<16x128xf32, #tpu.memory_space<vmem>>, %arg3: memref<16x128xf32, #tpu.memory_space<vmem>>, %arg4: memref<1x8x128xf32, #tpu.memory_space<vmem>>) attributes {dimension_semantics = [#tpu.dimension_semantics<parallel>, #tpu.dimension_semantics<arbitrary>], iteration_bounds = array<i64: 1, 1>, scalar_prefetch = 0 : i64, scratch_operands = 0 : i64, tpu.core_type = #tpu.core_type<tc>, window_params = [{transform_indices = @transform_0, window_bounds = array<i64: 16, 128>}, {transform_indices = @transform_1, window_bounds = array<i64: 16, 128>}, {transform_indices = @transform_2, window_bounds = array<i64: 1, 8, 128>}]} {
    %c0_i32 = arith.constant 0 : i32
    %0 = arith.cmpi eq, %arg1, %c0_i32 : i32
    %1 = arith.extui %0 : i1 to i32
    %c0_i32_0 = arith.constant 0 : i32
    %2 = arith.cmpi ne, %1, %c0_i32_0 : i32
    scf.if %2 {
      %cst_16 = arith.constant 0.000000e+00 : f32
      %29 = vector.broadcast %cst_16 : f32 to vector<8x128xf32>
      %c0_17 = arith.constant 0 : index
      %c0_18 = arith.constant 0 : index
      %c0_19 = arith.constant 0 : index
      %30 = vector.load %arg4[%c0_17, %c0_18, %c0_19] : memref<1x8x128xf32, #tpu.memory_space<vmem>>, vector<1x8x128xf32>
      %31 = vector.shape_cast %30 : vector<1x8x128xf32> to vector<8x128xf32>
      %32 = vector.shape_cast %29 : vector<8x128xf32> to vector<1x8x128xf32>
      tpu.vector_store %arg4[%c0_17, %c0_18, %c0_19], %32 {strides = array<i32>} : memref<1x8x128xf32, #tpu.memory_space<vmem>>, vector<1x8x128xf32>,
    } else {
    }
    %c0 = arith.constant 0 : index
    %c0_1 = arith.constant 0 : index
    %3 = vector.load %arg2[%c0, %c0_1] : memref<16x128xf32, #tpu.memory_space<vmem>>, vector<16x128xf32>
    %c0_2 = arith.constant 0 : index
    %c0_3 = arith.constant 0 : index
    %4 = vector.load %arg3[%c0_2, %c0_3] : memref<16x128xf32, #tpu.memory_space<vmem>>, vector<16x128xf32>
    %cst = arith.constant 5.000000e-01 : f32
    %5 = vector.broadcast %cst : f32 to vector<16x128xf32>
    %6 = arith.cmpf ogt, %4, %5 : vector<16x128xf32>
    %cst_4 = arith.constant 2.500000e-01 : f32
    %cst_5 = arith.constant 7.500000e-01 : f32
    %7 = vector.broadcast %cst_4 : f32 to vector<16x128xf32>
    %8 = vector.broadcast %cst_5 : f32 to vector<16x128xf32>
    %9 = arith.select %6, %7, %8 : vector<16x128xi1>, vector<16x128xf32>
    %cst_6 = arith.constant 1.000000e+00 : f32
    %10 = vector.broadcast %cst_6 : f32 to vector<16x128xf32>
    %11 = arith.subf %10, %3 : vector<16x128xf32>
    %12 = arith.select %6, %3, %11 : vector<16x128xi1>, vector<16x128xf32>
    %cst_7 = arith.constant 1.000000e+00 : f32
    %13 = vector.broadcast %cst_7 : f32 to vector<16x128xf32>
    %14 = arith.subf %13, %12 : vector<16x128xf32>
    %15 = arith.mulf %14, %14 : vector<16x128xf32>
    %cst_8 = arith.constant 0.000000e+00 : f32
    %16 = vector.broadcast %cst_8 : f32 to vector<16x128xf32>
    %17 = arith.subf %16, %9 : vector<16x128xf32>
    %18 = arith.mulf %17, %15 : vector<16x128xf32>
    %19 = math.log %12 : vector<16x128xf32>
    %20 = arith.mulf %18, %19 : vector<16x128xf32>
    %c0_9 = arith.constant 0 : index
    %c0_10 = arith.constant 0 : index
    %c0_11 = arith.constant 0 : index
    %21 = vector.load %arg4[%c0_9, %c0_10, %c0_11] : memref<1x8x128xf32, #tpu.memory_space<vmem>>, vector<1x8x128xf32>
    %22 = vector.shape_cast %21 : vector<1x8x128xf32> to vector<8x128xf32>
    %23 = vector.shape_cast %20 : vector<16x128xf32> to vector<2x8x128xf32>
    %cst_12 = arith.constant dense<0.000000e+00> : vector<8x128xf32>
    %24 = vector.multi_reduction <add>, %23, %cst_12 [0] : vector<2x8x128xf32> to vector<8x128xf32>
    %25 = arith.addf %22, %24 : vector<8x128xf32>
    %c0_13 = arith.constant 0 : index
    %c0_14 = arith.constant 0 : index
    %c0_15 = arith.constant 0 : index
    %26 = vector.load %arg4[%c0_13, %c0_14, %c0_15] : memref<1x8x128xf32, #tpu.memory_space<vmem>>, vector<1x8x128xf32>
    %27 = vector.shape_cast %26 : vector<1x8x128xf32> to vector<8x128xf32>
    %28 = vector.shape_cast %25 : vector<8x128xf32> to vector<1x8x128xf32>
    tpu.vector_store %arg4[%c0_13, %c0_14, %c0_15], %28 {strides = array<i32>} : memref<1x8x128xf32, #tpu.memory_space<vmem>>, vector<1x8x128xf32>,
    return
  }
  func.func @transform_0(%arg0: i32, %arg1: i32) -> (i32, i32) {
    %c1_i32 = arith.constant 1 : i32
    %0 = arith.muli %arg0, %c1_i32 : i32
    %1 = arith.addi %0, %arg1 : i32
    %c0_i32 = arith.constant 0 : i32
    %2 = arith.minsi %1, %c0_i32 : i32
    %c0_i32_0 = arith.constant 0 : i32
    %c0_i32_1 = arith.constant 0 : i32
    return %2, %c0_i32_0 : i32, i32
  }
  func.func @transform_1(%arg0: i32, %arg1: i32) -> (i32, i32) {
    %c1_i32 = arith.constant 1 : i32
    %0 = arith.muli %arg0, %c1_i32 : i32
    %1 = arith.addi %0, %arg1 : i32
    %c0_i32 = arith.constant 0 : i32
    %2 = arith.minsi %1, %c0_i32 : i32
    %c0_i32_0 = arith.constant 0 : i32
    %c0_i32_1 = arith.constant 0 : i32
    return %2, %c0_i32_0 : i32, i32
  }
  func.func @transform_2(%arg0: i32, %arg1: i32) -> (i32, i32, i32) {
    %c0_i32 = arith.constant 0 : i32
    %c0_i32_0 = arith.constant 0 : i32
    %c0_i32_1 = arith.constant 0 : i32
    return %arg0, %c0_i32, %c0_i32_0 : i32, i32, i32
  }
}

</mosaic_0001>

<bundles_post_ra>
// kernel: tpu_custom_call.1
= control target key start
LH: loop header
LB: loop body
LE: loop exit
PB: predicated region body
PF: predicated region fallthrough
CT: control target
= control target key end

     0   :  { %7 = vsyncpa [#allocation3], 0  ;;  %s222_s0 = inlined_call_operand.hbm [shape: f32[16,128], index: 0, kind: input, shape index: {}]   ;;  %s223_s1 = inlined_call_operand.hbm [shape: f32[16,128], index: 1, kind: input, shape index: {}]   ;;  %s224_s2 = inlined_call_operand.hbm [shape: f32[1,8,128], index: 2, kind: output, shape index: {}]  }
   0x1   :  { %8 = vsyncpa [#allocation6], 0 }
   0x2   :  { %9 = vsyncpa [#allocation4], 0  ;;  %s192_s9 = smov [#allocation2]  }
   0x3   :  { %s21_s10 = sshll.u32 %s192_s9, 4  ;;  %s22_s10 = int_to_ptr.vmem [resolvable:$true] %s21_s10 }
   0x4   :  { %s134_s11 = scalar_lea.vmem %s22_s10, 256  ;;  %p139_p1 = scmp.lt.s32.totalorder %s22_s10, %s22_s10 }
   0x5   :  { %p135_p0 = scmp.ne.s32.totalorder %s22_s10, %s134_s11  ;;  %p140_p2 = scmp.lt.s32.totalorder %s134_s11, %s134_s11 }
   0x7   :  { %p141_p3 = por %p140_p2, %p139_p1 }
   0x9   :  { %p142_p4 = pnand %p141_p3, %p135_p0 }
   0xb   :  { %145 = shalt.err (!%p142_p4)
}
   0xc   :  { %s193_s12 = smov 128   ;;  %s194_s13 = smov 8  }
   0xd   :  { %27 = dma.hbm_to_vmem [thread:$0]  %s222_s0, 256, %s22_s10, [#allocation3], %s193_s12, %s193_s12, %s194_s13  }
   0xe   :  { %s195_s16 = smov [#allocation5]  }
   0xf   :  { %s39_s17 = sshll.u32 %s195_s16, 4  ;;  %s40_s17 = int_to_ptr.vmem [resolvable:$true] %s39_s17 }
  0x10   :  { %s154_s18 = scalar_lea.vmem %s40_s17, 256  ;;  %p159_p6 = scmp.lt.s32.totalorder %s40_s17, %s40_s17 }
  0x11   :  { %p155_p5 = scmp.ne.s32.totalorder %s40_s17, %s154_s18  ;;  %p160_p7 = scmp.lt.s32.totalorder %s154_s18, %s154_s18 }
  0x13   :  { %p161_p8 = por %p160_p7, %p159_p6 }
  0x15   :  { %p162_p9 = pnand %p161_p8, %p155_p5 }
  0x17   :  { %165 = shalt.err (!%p162_p9)
}
  0x18   :  { %45 = dma.hbm_to_vmem [thread:$0]  %s223_s1, 256, %s40_s17, [#allocation6], %s193_s12, %s193_s12, %s194_s13  }
  0x19   :  { %186 = dma.done.wait [#allocation3], 256  }
  0x1a   :  { %187 = vsyncadd [#allocation3], 4294967040 }
  0x1b   :  { %188 = dma.done.wait [#allocation6], 256  }
  0x1c   :  { %189 = vsyncadd [#allocation6], 4294967040  ;;  %v65_v0 = vld [vmem:[#allocation2] sm:$0xff]  ;;  %v66_v1 = vld [vmem:[#allocation2 + $0x8] sm:$0xff]  ;;  %v196_v9 = vmov 0.75   ;;  %s197_s0 = smov [#allocation7]  }
  0x1d   :  { %v67_v2 = vld [vmem:[#allocation5] sm:$0xff]  ;;  %v68_v3 = vld [vmem:[#allocation5 + $0x8] sm:$0xff]  ;;  %v73_v4 = vsub.f32 1.0, %v65_v0  ;;  %v74_v5 = vsub.f32 1.0, %v66_v1  ;;  %s101_s1 = sshll.u32 %s197_s0, 4  ;;  %s102_s1 = int_to_ptr.vmem [resolvable:$true] %s101_s1 }
  0x1e   :  { %vm69_vm0 = vcmp.gt.f32.partialorder %v67_v2, 0.5  ;;  %vm70_vm1 = vcmp.gt.f32.partialorder %v68_v3, 0.5  ;;  %s166_s21 = scalar_lea.vmem %s102_s1, 128  ;;  %p171_p11 = scmp.lt.s32.totalorder %s102_s1, %s102_s1 }
  0x1f   :  { %v75_v6 = vsel %vm69_vm0, %v65_v0, %v73_v4  ;;  %v76_v7 = vsel %vm70_vm1, %v66_v1, %v74_v5  ;;  %v71_v10 = vsel %vm69_vm0, 0.25, %v196_v9  ;;  %v72_v12 = vsel %vm70_vm1, 0.25, %v196_v9  ;;  %p167_p10 = scmp.ne.s32.totalorder %s102_s1, %s166_s21  ;;  %p172_p12 = scmp.lt.s32.totalorder %s166_s21, %s166_s21 }
  0x20   :  { %122 = vlog2.f32 %v75_v6  ;;  %v77_v8 = vsub.f32 1.0, %v75_v6  ;;  %v78_v11 = vsub.f32 1.0, %v76_v7  ;;  %v81_v14 = vsub.f32 0.0, %v71_v10 }
  0x21   :  { %124 = vlog2.f32 %v76_v7  ;;  %v82_v16 = vsub.f32 0.0, %v72_v12  ;;  %p173_p13 = por %p172_p12, %p171_p11 }
  0x22   :  { %v79_v13 = vmul.f32 %v77_v8, %v77_v8  ;;  %v80_v15 = vmul.f32 %v78_v11, %v78_v11 }
  0x23   :  { %p174_p0 = pnand %p173_p13, %p167_p10 }
  0x24   :  { %v83_v17 = vmul.f32 %v81_v14, %v79_v13  ;;  %v84_v19 = vmul.f32 %v82_v16, %v80_v15 }
  0x2d   :  { %v123_v18 = vpop.eup %122 }
  0x2e   :  { %v125_v20 = vpop.eup %124  ;;  %v86_v21 = vmul.f32 0.6931472, %v123_v18 }
  0x2f   :  { %v88_v22 = vmul.f32 0.6931472, %v125_v20 }
  0x30   :  { %v89_v23 = vmul.f32 %v86_v21, %v83_v17 }
  0x31   :  { %v90_v24 = vmul.f32 %v88_v22, %v84_v19 }
  0x33   :  { %v92_v25 = vadd.f32 %v90_v24, %v89_v23 }
  0x35   :  { %94 = vst [vmem:[#allocation7] sm:$0xff] %v92_v25 }
  0x36   :  { %177 = shalt.err (!%p174_p0)
}
  0x37   :  { %104 = dma.vmem_to_hbm [thread:$0]  %s102_s1, 128, %s224_s2, [#allocation4]  }
  0x38   :  { %190 = dma.done.wait [#allocation4], 128  }
  0x39   :  { %191 = vsyncadd [#allocation4], 4294967168 }
  0x3a   :  { %108 = vsyncpa [#allocation3], 1 }
  0x3b   :  { %109 = vsyncpa [#allocation6], 1 }
  0x3c   :  { %110 = vsyncpa [#allocation4], 1 }

</bundles_post_ra>
